<compile_context>
chip_gen: v5e
topology: v5e:2x2
jax: 0.10.0
libtpu: 0.0.40
codegen_flags: <defaults>
</compile_context>

<pallas_src>
from functools import partial

import jax
import jax.numpy as jnp
from jax import lax
from jax.experimental import pallas as pl
from jax.experimental.pallas import tpu as pltpu


def _mlp_kernel(x_ref, w1_ref, b1_ref, w2_ref, b2_ref, w3_ref, b3_ref,
                w4_ref, b4_ref, o_ref):
    # x block is [TILE_B, in_feat]; contract both operands on dim-1 so the batch
    # dimension lands on the 128-lane axis of the result (no wrapper transpose).
    h = lax.dot_general(w1_ref[...], x_ref[...],
                        dimension_numbers=(((1,), (1,)), ((), ())),
                        preferred_element_type=jnp.float32) + b1_ref[...]
    h = jnp.maximum(h, 0.0)                                               # [64, TB]

    h = jnp.dot(w2_ref[...], h, preferred_element_type=jnp.float32) + b2_ref[...]
    h = jnp.maximum(h, 0.0)                                               # [32, TB]

    h = jnp.dot(w3_ref[...], h, preferred_element_type=jnp.float32) + b3_ref[...]
    h = jnp.maximum(h, 0.0)                                               # [16, TB]

    logit = jnp.dot(w4_ref[...], h, preferred_element_type=jnp.float32) + b4_ref[...]
    o_ref[...] = jax.nn.sigmoid(logit).astype(o_ref.dtype)               # [1, TB]


def _round_up(n, m):
    return ((n + m - 1) // m) * m


@partial(jax.jit, static_argnames=("tile_b", "compute_dtype"))
def diabetes_forward(x, params, *, tile_b=8192, compute_dtype=jnp.float32):
    """x: [batch, input_size] f32.  params: PyTorch-layout w{i} [out,in], b{i} [out,1]."""
    batch, in_feat = x.shape
    w1, b1, w2, b2, w3, b3, w4, b4 = (params[k] for k in
                                      ("w1", "b1", "w2", "b2", "w3", "b3", "w4", "b4"))

    # MXU input streams may be downcast (bf16 on v6e/v7x); bias/ReLU/sigmoid stay f32.
    x = x.astype(compute_dtype)
    w1, w2, w3, w4 = (w.astype(compute_dtype) for w in (w1, w2, w3, w4))

    # Batch tile: lane-aligned (multiple of 128), at most tile_b, and capped at
    # ~half the (rounded) batch so large batches give >=2 grid steps for v7x
    # megacore sharding.  Last grid step may be a partial block (no padding).
    tile = min(tile_b, max(128, _round_up(pl.cdiv(batch, 2), 128)))
    grid = (pl.cdiv(batch, tile),)

    # Weights/biases: constant block index -> VMEM-resident across all grid steps.
    resident = lambda a: pl.BlockSpec(a.shape, lambda i: (0, 0))

    out_t = pl.pallas_call(
        _mlp_kernel,
        out_shape=jax.ShapeDtypeStruct((1, batch), jnp.float32),
        grid=grid,
        in_specs=[pl.BlockSpec((tile, in_feat), lambda i: (i, 0)),
                  resident(w1), resident(b1),
                  resident(w2), resident(b2),
                  resident(w3), resident(b3),
                  resident(w4), resident(b4)],
        out_specs=pl.BlockSpec((1, tile), lambda i: (0, i)),
        compiler_params=pltpu.CompilerParams(
            dimension_semantics=("parallel",)),
    )(x, w1, b1, w2, b2, w3, b3, w4, b4)

    return out_t.T                                        # [batch, 1]


def init_params(key, input_size):
    """PyTorch nn.Linear init: uniform(-1/sqrt(fan_in), 1/sqrt(fan_in)), [out,in] layout."""
    dims = [(input_size, 64), (64, 32), (32, 16), (16, 1)]
    params = {}
    for i, (fan_in, fan_out) in enumerate(dims, start=1):
        key, kw, kb = jax.random.split(key, 3)
        bound = 1.0 / jnp.sqrt(jnp.float32(fan_in))
        params[f"w{i}"] = jax.random.uniform(kw, (fan_out, fan_in), jnp.float32,
                                             -bound, bound)
        params[f"b{i}"] = jax.random.uniform(kb, (fan_out, 1), jnp.float32,
                                             -bound, bound)
    return params


def reference_forward(x, params):
    h = x
    for i in range(1, 4):
        h = jnp.maximum(h @ params[f"w{i}"].T + params[f"b{i}"].T, 0.0)
    logit = h @ params["w4"].T + params["b4"].T
    return jax.nn.sigmoid(logit)


if __name__ == "__main__":
    key = jax.random.PRNGKey(0)
    batch, input_size = 16, 8  # diabetes dataset: 8 features

    key, kx = jax.random.split(key)
    x = jax.random.normal(kx, (batch, input_size), jnp.float32)
    params = init_params(key, input_size)

    out = diabetes_forward(x, params)            # f32 path -> 1e-5 tolerance holds
    out = jax.block_until_ready(out)

    ref = reference_forward(x, params)
    assert out.shape == (batch, 1), out.shape
    assert jnp.allclose(out, ref, atol=1e-5, rtol=1e-5), (
        float(jnp.max(jnp.abs(out - ref))))
    print("KERNEL_OK")
</pallas_src>

<mosaic_0001>
module attributes {stable_mosaic.version = 11 : i64} {
  func.func @_mlp_kernel(%arg0: i32, %arg1: memref<128x8xf32, #tpu.memory_space<vmem>>, %arg2: memref<64x8xf32, #tpu.memory_space<vmem>>, %arg3: memref<64x1xf32, #tpu.memory_space<vmem>>, %arg4: memref<32x64xf32, #tpu.memory_space<vmem>>, %arg5: memref<32x1xf32, #tpu.memory_space<vmem>>, %arg6: memref<16x32xf32, #tpu.memory_space<vmem>>, %arg7: memref<16x1xf32, #tpu.memory_space<vmem>>, %arg8: memref<1x16xf32, #tpu.memory_space<vmem>>, %arg9: memref<1x1xf32, #tpu.memory_space<vmem>>, %arg10: memref<1x128xf32, #tpu.memory_space<vmem>>) attributes {dimension_semantics = [#tpu.dimension_semantics<parallel>], iteration_bounds = array<i64: 1>, scalar_prefetch = 0 : i64, scratch_operands = 0 : i64, tpu.core_type = #tpu.core_type<tc>, window_params = [{transform_indices = @transform_0, window_bounds = array<i64: 128, 8>}, {pipeline_mode = #tpu.pipeline_mode<synchronous>, transform_indices = @transform_1, window_bounds = array<i64: 64, 8>}, {pipeline_mode = #tpu.pipeline_mode<synchronous>, transform_indices = @transform_2, window_bounds = array<i64: 64, 1>}, {pipeline_mode = #tpu.pipeline_mode<synchronous>, transform_indices = @transform_3, window_bounds = array<i64: 32, 64>}, {pipeline_mode = #tpu.pipeline_mode<synchronous>, transform_indices = @transform_4, window_bounds = array<i64: 32, 1>}, {pipeline_mode = #tpu.pipeline_mode<synchronous>, transform_indices = @transform_5, window_bounds = array<i64: 16, 32>}, {pipeline_mode = #tpu.pipeline_mode<synchronous>, transform_indices = @transform_6, window_bounds = array<i64: 16, 1>}, {pipeline_mode = #tpu.pipeline_mode<synchronous>, transform_indices = @transform_7, window_bounds = array<i64: 1, 16>}, {pipeline_mode = #tpu.pipeline_mode<synchronous>, transform_indices = @transform_8, window_bounds = array<i64: 1, 1>}, {transform_indices = @transform_9, window_bounds = array<i64: 1, 128>}]} {
    %c0 = arith.constant 0 : index
    %c0_0 = arith.constant 0 : index
    %0 = vector.load %arg2[%c0, %c0_0] : memref<64x8xf32, #tpu.memory_space<vmem>>, vector<64x8xf32>
    %c0_1 = arith.constant 0 : index
    %c0_2 = arith.constant 0 : index
    %1 = vector.load %arg1[%c0_1, %c0_2] : memref<128x8xf32, #tpu.memory_space<vmem>>, vector<128x8xf32>
    %cst = arith.constant dense<0.000000e+00> : vector<64x128xf32>
    %2 = tpu.matmul %0, %1, %cst {dimension_numbers = #tpu.dot_dimension_numbers<[1], [1], [0], [0], [0, 0, 1, 0], [], []>} : vector<64x8xf32>, vector<128x8xf32>, vector<64x128xf32> -> vector<64x128xf32>
    %c0_3 = arith.constant 0 : index
    %c0_4 = arith.constant 0 : index
    %3 = vector.load %arg3[%c0_3, %c0_4] : memref<64x1xf32, #tpu.memory_space<vmem>>, vector<64x1xf32>
    %4 = vector.broadcast %3 : vector<64x1xf32> to vector<64x128xf32>
    %5 = arith.addf %2, %4 : vector<64x128xf32>
    %cst_5 = arith.constant 0.000000e+00 : f32
    %6 = vector.broadcast %cst_5 : f32 to vector<64x128xf32>
    %7 = arith.maximumf %5, %6 : vector<64x128xf32>
    %c0_6 = arith.constant 0 : index
    %c0_7 = arith.constant 0 : index
    %8 = vector.load %arg4[%c0_6, %c0_7] : memref<32x64xf32, #tpu.memory_space<vmem>>, vector<32x64xf32>
    %cst_8 = arith.constant dense<0.000000e+00> : vector<32x128xf32>
    %9 = tpu.matmul %8, %7, %cst_8 {dimension_numbers = #tpu.dot_dimension_numbers<[1], [0], [0], [1], [0, 0, 1, 1], [], []>} : vector<32x64xf32>, vector<64x128xf32>, vector<32x128xf32> -> vector<32x128xf32>
    %c0_9 = arith.constant 0 : index
    %c0_10 = arith.constant 0 : index
    %10 = vector.load %arg5[%c0_9, %c0_10] : memref<32x1xf32, #tpu.memory_space<vmem>>, vector<32x1xf32>
    %11 = vector.broadcast %10 : vector<32x1xf32> to vector<32x128xf32>
    %12 = arith.addf %9, %11 : vector<32x128xf32>
    %cst_11 = arith.constant 0.000000e+00 : f32
    %13 = vector.broadcast %cst_11 : f32 to vector<32x128xf32>
    %14 = arith.maximumf %12, %13 : vector<32x128xf32>
    %c0_12 = arith.constant 0 : index
    %c0_13 = arith.constant 0 : index
    %15 = vector.load %arg6[%c0_12, %c0_13] : memref<16x32xf32, #tpu.memory_space<vmem>>, vector<16x32xf32>
    %cst_14 = arith.constant dense<0.000000e+00> : vector<16x128xf32>
    %16 = tpu.matmul %15, %14, %cst_14 {dimension_numbers = #tpu.dot_dimension_numbers<[1], [0], [0], [1], [0, 0, 1, 1], [], []>} : vector<16x32xf32>, vector<32x128xf32>, vector<16x128xf32> -> vector<16x128xf32>
    %c0_15 = arith.constant 0 : index
    %c0_16 = arith.constant 0 : index
    %17 = vector.load %arg7[%c0_15, %c0_16] : memref<16x1xf32, #tpu.memory_space<vmem>>, vector<16x1xf32>
    %18 = vector.broadcast %17 : vector<16x1xf32> to vector<16x128xf32>
    %19 = arith.addf %16, %18 : vector<16x128xf32>
    %cst_17 = arith.constant 0.000000e+00 : f32
    %20 = vector.broadcast %cst_17 : f32 to vector<16x128xf32>
    %21 = arith.maximumf %19, %20 : vector<16x128xf32>
    %c0_18 = arith.constant 0 : index
    %c0_19 = arith.constant 0 : index
    %22 = vector.load %arg8[%c0_18, %c0_19] : memref<1x16xf32, #tpu.memory_space<vmem>>, vector<1x16xf32>
    %cst_20 = arith.constant dense<0.000000e+00> : vector<1x128xf32>
    %23 = tpu.matmul %22, %21, %cst_20 {dimension_numbers = #tpu.dot_dimension_numbers<[1], [0], [0], [1], [0, 0, 1, 1], [], []>} : vector<1x16xf32>, vector<16x128xf32>, vector<1x128xf32> -> vector<1x128xf32>
    %c0_21 = arith.constant 0 : index
    %c0_22 = arith.constant 0 : index
    %24 = vector.load %arg9[%c0_21, %c0_22] : memref<1x1xf32, #tpu.memory_space<vmem>>, vector<1x1xf32>
    %25 = vector.broadcast %24 : vector<1x1xf32> to vector<1x128xf32>
    %26 = arith.addf %23, %25 : vector<1x128xf32>
    %27 = arith.negf %26 : vector<1x128xf32>
    %28 = math.exp %27 : vector<1x128xf32>
    %cst_23 = arith.constant 1.000000e+00 : f32
    %29 = vector.broadcast %cst_23 : f32 to vector<1x128xf32>
    %30 = arith.addf %29, %28 : vector<1x128xf32>
    %31 = arith.divf %29, %30 : vector<1x128xf32>
    %c0_24 = arith.constant 0 : index
    %c0_25 = arith.constant 0 : index
    %32 = vector.load %arg10[%c0_24, %c0_25] : memref<1x128xf32, #tpu.memory_space<vmem>>, vector<1x128xf32>
    tpu.vector_store %arg10[%c0_24, %c0_25], %31 {strides = array<i32>} : memref<1x128xf32, #tpu.memory_space<vmem>>, vector<1x128xf32>,
    return
  }
  func.func @transform_0(%arg0: i32) -> (i32, i32) {
    %c0_i32 = arith.constant 0 : i32
    %c0_i32_0 = arith.constant 0 : i32
    return %arg0, %c0_i32 : i32, i32
  }
  func.func @transform_1(%arg0: i32) -> (i32, i32) {
    %c0_i32 = arith.constant 0 : i32
    %c0_i32_0 = arith.constant 0 : i32
    %c0_i32_1 = arith.constant 0 : i32
    return %c0_i32, %c0_i32_0 : i32, i32
  }
  func.func @transform_2(%arg0: i32) -> (i32, i32) {
    %c0_i32 = arith.constant 0 : i32
    %c0_i32_0 = arith.constant 0 : i32
    %c0_i32_1 = arith.constant 0 : i32
    return %c0_i32, %c0_i32_0 : i32, i32
  }
  func.func @transform_3(%arg0: i32) -> (i32, i32) {
    %c0_i32 = arith.constant 0 : i32
    %c0_i32_0 = arith.constant 0 : i32
    %c0_i32_1 = arith.constant 0 : i32
    return %c0_i32, %c0_i32_0 : i32, i32
  }
  func.func @transform_4(%arg0: i32) -> (i32, i32) {
    %c0_i32 = arith.constant 0 : i32
    %c0_i32_0 = arith.constant 0 : i32
    %c0_i32_1 = arith.constant 0 : i32
    return %c0_i32, %c0_i32_0 : i32, i32
  }
  func.func @transform_5(%arg0: i32) -> (i32, i32) {
    %c0_i32 = arith.constant 0 : i32
    %c0_i32_0 = arith.constant 0 : i32
    %c0_i32_1 = arith.constant 0 : i32
    return %c0_i32, %c0_i32_0 : i32, i32
  }
  func.func @transform_6(%arg0: i32) -> (i32, i32) {
    %c0_i32 = arith.constant 0 : i32
    %c0_i32_0 = arith.constant 0 : i32
    %c0_i32_1 = arith.constant 0 : i32
    return %c0_i32, %c0_i32_0 : i32, i32
  }
  func.func @transform_7(%arg0: i32) -> (i32, i32) {
    %c0_i32 = arith.constant 0 : i32
    %c0_i32_0 = arith.constant 0 : i32
    %c0_i32_1 = arith.constant 0 : i32
    return %c0_i32, %c0_i32_0 : i32, i32
  }
  func.func @transform_8(%arg0: i32) -> (i32, i32) {
    %c0_i32 = arith.constant 0 : i32
    %c0_i32_0 = arith.constant 0 : i32
    %c0_i32_1 = arith.constant 0 : i32
    return %c0_i32, %c0_i32_0 : i32, i32
  }
  func.func @transform_9(%arg0: i32) -> (i32, i32) {
    %c0_i32 = arith.constant 0 : i32
    %c0_i32_0 = arith.constant 0 : i32
    return %c0_i32, %arg0 : i32, i32
  }
}

</mosaic_0001>

<bundles_post_ra>
// kernel: diabetes_forward.1
= control target key start
LH: loop header
LB: loop body
LE: loop exit
PB: predicated region body
PF: predicated region fallthrough
CT: control target
= control target key end

     0   :  { %s701_s0 = inlined_call_operand.vmem [shape: f32[16,8], index: 0, kind: input, shape index: {}]   ;;  %s702_s1 = inlined_call_operand.vmem [shape: f32[64,8], index: 1, kind: input, shape index: {}]   ;;  %s703_s2 = inlined_call_operand.vmem [shape: f32[64,1], index: 2, kind: input, shape index: {}]   ;;  %s704_s3 = inlined_call_operand.vmem [shape: f32[32,64], index: 3, kind: input, shape index: {}]   ;;  %s705_s4 = inlined_call_operand.vmem [shape: f32[32,1], index: 4, kind: input, shape index: {}]   ;;  %s706_s5 = inlined_call_operand.vmem [shape: f32[16,32], index: 5, kind: input, shape index: {}]   ;;  %s707_s6 = inlined_call_operand.vmem [shape: f32[16,1], index: 6, kind: input, shape index: {}]   ;;  %s708_s7 = inlined_call_operand.vmem [shape: f32[1,16], index: 7, kind: input, shape index: {}]   ;;  %s709_s8 = inlined_call_operand.<no memory space> [shape: f32[1,1], index: 8, kind: input, shape index: {}]   ;;  %s710_s9 = inlined_call_operand.hbm [shape: f32[1,16], index: 9, kind: output, shape index: {}]  }
   0x1   :  { %v14_v0 = vstv %s709_s8 }
   0x2   :  { %15 = vst [vmem:[#allocation2] sm:$0x1] %v14_v0 }
   0x3   :  { %v58_v1 = vld [vmem:[%s701_s0 + $0x78] sm:$0xff]  ;;  %vm107_vm0 = vcmask 64512   ;;  %v57_v2 = vld [vmem:[%s701_s0 + $0x70] sm:$0xff] }
   0x4   :  { %417 = vmatpush.xpose.msk.msra.mxu0 %vm107_vm0, %v58_v1 }
   0x5   :  { %16 = vsyncpa [#allocation4], 0  ;;  %v56_v3 = vld [vmem:[%s701_s0 + $0x68] sm:$0xff]  ;;  %v55_v4 = vld [vmem:[%s701_s0 + $0x60] sm:$0xff]  ;;  %v484_v10 = vmov 0   ;;  %vm257_vm1 = vcmask 523264  }
   0x6   :  { %v54_v5 = vld [vmem:[%s701_s0 + $0x58] sm:$0xff]  ;;  %v53_v6 = vld [vmem:[%s701_s0 + $0x50] sm:$0xff]  ;;  %v52_v7 = vld [vmem:[%s701_s0 + $0x48] sm:$0xff]  ;;  %452 = vset.pattern.permute.xlu1 %v484_v10  ;;  %451 = vset.pattern.permute.xlu0 %v484_v10  ;;  %vm317_vm2 = vcmask 261120   ;;  %vm357_vm3 = vcmask 130048   ;;  %s408_s28 = sshll.u32 %s710_s9, 4  ;;  %s409_s28 = int_to_ptr.hbm [resolvable:$true] %s408_s28 }
   0x7   :  { %v64_v8 = vld [vmem:[%s703_s2 + $0x28] sm:$0xff]  ;;  %v51_v9 = vld [vmem:[%s701_s0 + $0x40] sm:$0xff]  ;;  %453 = vset.pattern.permute.xlu2 %v484_v10  ;;  %v50_v11 = vld [vmem:[%s701_s0 + $0x38] sm:$0xff] }
   0x8   :  { %418 = vmatpush.xpose.msk.msra.mxu0 %vm107_vm0, %v57_v2  ;;  %94 = vperm.xlu1 %452, %v64_v8   ;;  %v66_v12 = vld [vmem:[%s703_s2 + $0x38] sm:$0xff]  ;;  %v63_v13 = vld [vmem:[%s703_s2 + $0x20] sm:$0xff]  ;;  %v49_v14 = vld [vmem:[%s701_s0 + $0x30] sm:$0xff] }
   0x9   :  { %104 = vperm.xlu0 %451, %v66_v12   ;;  %v48_v15 = vld [vmem:[%s701_s0 + $0x28] sm:$0xff]  ;;  %v65_v16 = vld [vmem:[%s703_s2 + $0x30] sm:$0xff]  ;;  %v59_v17 = vld [vmem:[%s703_s2] sm:$0xff] }
   0xa   :  { %v47_v18 = vld [vmem:[%s701_s0 + $0x20] sm:$0xff]  ;;  %v46_v19 = vld [vmem:[%s701_s0 + $0x18] sm:$0xff]  ;;  %v60_v20 = vld [vmem:[%s703_s2 + $0x8] sm:$0xff] }
   0xb   :  { %v45_v21 = vld [vmem:[%s701_s0 + $0x10] sm:$0xff]  ;;  %v44_v22 = vld [vmem:[%s701_s0 + $0x8] sm:$0xff]  ;;  %v43_v23 = vld [vmem:[%s701_s0] sm:$0xff] }
   0xc   :  { %419 = vmatpush.xpose.msk.msra.mxu0 %vm107_vm0, %v56_v3  ;;  %v35_v24 = vld [vmem:[%s702_s1] sm:$0xff]  ;;  %v36_v25 = vld [vmem:[%s702_s1 + $0x8] sm:$0xff]  ;;  %v62_v26 = vld [vmem:[%s703_s2 + $0x18] sm:$0xff] }
   0xd   :  { %84 = vperm.xlu2 %453, %v62_v26   ;;  %v37_v27 = vld [vmem:[%s702_s1 + $0x10] sm:$0xff]  ;;  %v38_v30 = vld [vmem:[%s702_s1 + $0x18] sm:$0xff]  ;;  %v234_v31 = vld [vmem:[%s705_s4 + $0x8] sm:$0xff] }
   0xe   :  { %v61_v28 = vld [vmem:[%s703_s2 + $0x10] sm:$0xff]  ;;  %v306_v32 = vld [vmem:[%s707_s6 + $0x8] sm:$0xff]  ;;  %v236_v33 = vld [vmem:[%s705_s4 + $0x18] sm:$0xff] }
   0xf   :  { %v235_v29 = vld [vmem:[%s705_s4 + $0x10] sm:$0xff]  ;;  %v39_v34 = vld [vmem:[%s702_s1 + $0x20] sm:$0xff]  ;;  %v40_v37 = vld [vmem:[%s702_s1 + $0x28] sm:$0xff] }
  0x10   :  { %420 = vmatpush.xpose.msk.msra.mxu0 %vm107_vm0, %v55_v4  ;;  %89 = vperm.xlu1 %452, %v63_v13   ;;  %v305_v35 = vld [vmem:[%s707_s6] sm:$0xff]  ;;  %v41_v39 = vld [vmem:[%s702_s1 + $0x30] sm:$0xff]  ;;  %v42_v40 = vld [vmem:[%s702_s1 + $0x38] sm:$0xff] }
  0x11   :  { %99 = vperm.xlu0 %451, %v65_v16   ;;  %v233_v36 = vld [vmem:[%s705_s4] sm:$0xff]  ;;  %v230_v10 = vld [vmem:[%s704_s3 + $0x8] sm:$0xff]  ;;  %v232_v12 = vld [vmem:[%s704_s3 + $0x18] sm:$0xff] }
  0x12   :  { %v350_v38 = vld [vmem:[#allocation2] sm:$0x1] }
  0x14   :  { %421 = vmatpush.xpose.msk.msra.mxu0 %vm107_vm0, %v54_v5 }
  0x15   :  { %79 = vperm.xlu2 %453, %v61_v28  }
  0x18   :  { %422 = vmatpush.xpose.msk.msra.mxu0 %vm107_vm0, %v53_v6  ;;  %69 = vperm.xlu1 %452, %v59_v17  }
  0x19   :  { %74 = vperm.xlu0 %451, %v60_v20  }
  0x1c   :  { %423 = vmatpush.xpose.msk.msra.mxu0 %vm107_vm0, %v52_v7 }
  0x1d   :  { %254 = vperm.xlu2 %453, %v236_v33  }
  0x20   :  { %424 = vmatpush.xpose.msk.msra.mxu0 %vm107_vm0, %v51_v9  ;;  %244 = vperm.xlu1 %452, %v234_v31   ;;  %v229_v9 = vld [vmem:[%s704_s3] sm:$0xff] }
  0x21   :  { %249 = vperm.xlu0 %451, %v235_v29   ;;  %v303_v29 = vld [vmem:[%s706_s5] sm:$0xff] }
  0x24   :  { %425 = vmatpush.xpose.msk.msra.mxu0 %vm107_vm0, %v50_v11  ;;  %v231_v11 = vld [vmem:[%s704_s3 + $0x10] sm:$0xff] }
  0x25   :  { %239 = vperm.xlu2 %453, %v233_v36  }
  0x28   :  { %426 = vmatpush.xpose.msk.msra.mxu0 %vm107_vm0, %v49_v14  ;;  %309 = vperm.xlu1 %452, %v305_v35  }
  0x29   :  { %314 = vperm.xlu0 %451, %v306_v32  }
  0x2c   :  { %427 = vmatpush.xpose.msk.msra.mxu0 %vm107_vm0, %v48_v15 }
  0x2d   :  { %353 = vperm.xlu2 %453, %v350_v38  }
  0x30   :  { %428 = vmatpush.xpose.msk.msra.mxu0 %vm107_vm0, %v47_v18 }
  0x34   :  { %429 = vmatpush.xpose.msk.msra.mxu0 %vm107_vm0, %v46_v19 }
  0x38   :  { %430 = vmatpush.xpose.msk.msra.mxu0 %vm107_vm0, %v45_v21 }
  0x3c   :  { %431 = vmatpush.xpose.msk.msra.mxu0 %vm107_vm0, %v44_v22 }
  0x40   :  { %432 = vmatpush.xpose.msk.msra.mxu0 %vm107_vm0, %v43_v23 }
  0x43   :  { %433 = vmatmul.msk.f32.vlgmr.msra.gmra.mxu0 %vm107_vm0, %v35_v24 }
  0x4b   :  { %434 = vmatmul.msk.f32.gmra.mxu0 %vm107_vm0, %v36_v25 }
  0x53   :  { %435 = vmatmul.msk.f32.gmra.mxu0 %vm107_vm0, %v37_v27 }
  0x5b   :  { %436 = vmatmul.msk.f32.gmra.mxu0 %vm107_vm0, %v38_v30  ;;  %v304_v30 = vld [vmem:[%s706_s5 + $0x8] sm:$0xff]  ;;  %s485_s5 = smov [#allocation3]  }
  0x63   :  { %437 = vmatmul.msk.f32.gmra.mxu0 %vm107_vm0, %v39_v34 }
  0x67   :  { %v85_v50 = vpop.permute.xlu2 %84 }
  0x6b   :  { %438 = vmatmul.msk.f32.gmra.mxu0 %vm107_vm0, %v40_v37 }
  0x6f   :  { %v80_v60 = vpop.permute.xlu2 %79 }
  0x73   :  { %439 = vmatmul.msk.f32.gmra.mxu0 %vm107_vm0, %v41_v39  ;;  %v349_v39 = vld [vmem:[%s708_s7] sm:$0x1]  ;;  %s406_s7 = sshll.u32 %s485_s5, 4  ;;  %s407_s7 = int_to_ptr.vmem [resolvable:$true] %s406_s7 }
  0x77   :  { %v255_v16 = vpop.permute.xlu2 %254 }
  0x7a   :  { %v95_v48 = vpop.permute.xlu1 %94 }
  0x7b   :  { %440 = vmatmul.msk.f32.gmra.mxu0 %vm107_vm0, %v42_v40  ;;  %v105_v47 = vpop.permute.xlu0 %104 }
  0x7f   :  { %v240_v24 = vpop.permute.xlu2 %239 }
  0x82   :  { %v90_v52 = vpop.permute.xlu1 %89 }
  0x83   :  { %v100_v51 = vpop.permute.xlu0 %99 }
  0x87   :  { %v354_v40 = vpop.permute.xlu2 %353 }
  0x8a   :  { %v70_v2 = vpop.permute.xlu1 %69 }
  0x8b   :  { %v75_v63 = vpop.permute.xlu0 %74 }
  0x92   :  { %v245_v21 = vpop.permute.xlu1 %244 }
  0x93   :  { %v250_v17 = vpop.permute.xlu0 %249 }
  0x9a   :  { %v310_v33 = vpop.permute.xlu1 %309 }
  0x9b   :  { %v315_v32 = vpop.permute.xlu0 %314 }
  0xc0   :  { %v197_v41 = vpop.f32.mrf.mxu0 }
  0xc1   :  { %v198_v5 = vadd.f32 %v197_v41, %v70_v2  ;;  %v356_v41 = vperm.slane %v354_v40, 0 }
  0xc3   :  { %v221_v8 = vmax.f32 %v198_v5, 0.0 }
  0xc8   :  { %v200_v42 = vpop.f32.mrf.mxu0 }
  0xc9   :  { %v201_v3 = vadd.f32 %v200_v42, %v75_v63 }
  0xcb   :  { %v222_v7 = vmax.f32 %v201_v3, 0.0 }
  0xd0   :  { %v203_v43 = vpop.f32.mrf.mxu0 }
  0xd1   :  { %v204_v0 = vadd.f32 %v203_v43, %v80_v60 }
  0xd3   :  { %v223_v6 = vmax.f32 %v204_v0, 0.0 }
  0xd8   :  { %v206_v44 = vpop.f32.mrf.mxu0 }
  0xd9   :  { %v207_v61 = vadd.f32 %v206_v44, %v85_v50 }
  0xdb   :  { %v224_v4 = vmax.f32 %v207_v61, 0.0 }
  0xe0   :  { %v209_v45 = vpop.f32.mrf.mxu0 }
  0xe1   :  { %v210_v58 = vadd.f32 %v209_v45, %v90_v52 }
  0xe3   :  { %v225_v1 = vmax.f32 %v210_v58, 0.0 }
  0xe8   :  { %v212_v46 = vpop.f32.mrf.mxu0 }
  0xe9   :  { %v213_v56 = vadd.f32 %v212_v46, %v95_v48 }
  0xeb   :  { %v226_v62 = vmax.f32 %v213_v56, 0.0 }
  0xf0   :  { %v215_v49 = vpop.f32.mrf.mxu0 }
  0xf1   :  { %v216_v54 = vadd.f32 %v215_v49, %v100_v51 }
  0xf3   :  { %v227_v59 = vmax.f32 %v216_v54, 0.0 }
  0xf8   :  { %v218_v53 = vpop.f32.mrf.mxu0 }
  0xf9   :  { %v219_v55 = vadd.f32 %v218_v53, %v105_v47 }
  0xfb   :  { %v228_v57 = vmax.f32 %v219_v55, 0.0 }
  0xfd   :  { %278 = vmatpush.msra.mxu1 %v228_v57 }
  0xff   :  { %279 = vmatpush.msra.mxu1 %v227_v59 }
 0x101   :  { %280 = vmatpush.msra.mxu1 %v226_v62 }
 0x103   :  { %281 = vmatpush.msra.mxu1 %v225_v1 }
 0x105   :  { %282 = vmatpush.msra.mxu1 %v224_v4 }
 0x107   :  { %283 = vmatpush.msra.mxu1 %v223_v6 }
 0x109   :  { %284 = vmatpush.msra.mxu1 %v222_v7 }
 0x10b   :  { %285 = vmatpush.msra.mxu1 %v221_v8 }
 0x10c   :  { %441 = vmatmul.msk.f32.vlgmr.msra.gmra.mxu1 %vm257_vm1, %v229_v9 }
 0x114   :  { %442 = vmatmul.msk.f32.gmra.mxu1 %vm257_vm1, %v230_v10 }
 0x11c   :  { %443 = vmatmul.msk.f32.gmra.mxu1 %vm257_vm1, %v231_v11 }
 0x124   :  { %444 = vmatmul.msk.f32.gmra.mxu1 %vm257_vm1, %v232_v12 }
 0x189   :  { %v287_v13 = vpop.f32.mrf.mxu1 }
 0x18a   :  { %v288_v25 = vadd.f32 %v287_v13, %v240_v24 }
 0x18c   :  { %v299_v28 = vmax.f32 %v288_v25, 0.0 }
 0x191   :  { %v290_v14 = vpop.f32.mrf.mxu1 }
 0x192   :  { %v291_v22 = vadd.f32 %v290_v14, %v245_v21 }
 0x194   :  { %v300_v27 = vmax.f32 %v291_v22, 0.0 }
 0x199   :  { %v293_v15 = vpop.f32.mrf.mxu1 }
 0x19a   :  { %v294_v19 = vadd.f32 %v293_v15, %v250_v17 }
 0x19c   :  { %v301_v26 = vmax.f32 %v294_v19, 0.0 }
 0x1a1   :  { %v296_v18 = vpop.f32.mrf.mxu1 }
 0x1a2   :  { %v297_v20 = vadd.f32 %v296_v18, %v255_v16 }
 0x1a4   :  { %v302_v23 = vmax.f32 %v297_v20, 0.0 }
 0x1a6   :  { %336 = vmatpush.msra.mxu2 %v302_v23 }
 0x1a8   :  { %337 = vmatpush.msra.mxu2 %v301_v26 }
 0x1aa   :  { %338 = vmatpush.msra.mxu2 %v300_v27 }
 0x1ac   :  { %339 = vmatpush.msra.mxu2 %v299_v28 }
 0x1ad   :  { %445 = vmatmul.msk.f32.vlgmr.msra.gmra.mxu2 %vm317_vm2, %v303_v29 }
 0x1b5   :  { %446 = vmatmul.msk.f32.gmra.mxu2 %vm317_vm2, %v304_v30 }
 0x230   :  { %v341_v31 = vpop.f32.mrf.mxu2 }
 0x231   :  { %v342_v35 = vadd.f32 %v341_v31, %v310_v33 }
 0x233   :  { %v347_v38 = vmax.f32 %v342_v35, 0.0 }
 0x238   :  { %v344_v34 = vpop.f32.mrf.mxu2 }
 0x239   :  { %v345_v36 = vadd.f32 %v344_v34, %v315_v32 }
 0x23b   :  { %v348_v37 = vmax.f32 %v345_v36, 0.0 }
 0x23d   :  { %375 = vmatpush.msra.mxu3 %v348_v37 }
 0x23f   :  { %376 = vmatpush.msra.mxu3 %v347_v38 }
 0x240   :  { %447 = vmatmul.msk.f32.vlgmr.msra.gmra.mxu3 %vm357_vm3, %v349_v39 }
 0x2c3   :  { %v378_v42 = vpop.f32.mrf.mxu3 }
 0x2c4   :  { %v379_v43 = vadd.f32 %v378_v42, %v356_v41 }
 0x2c6   :  { %v448_v44 = vmul.f32 -1.442695, %v379_v43 }
 0x2c8   :  { %454 = vpow2.f32 %v448_v44 }
 0x2ce   :  { %v455_v45 = vpop.eup %454 }
 0x2cf   :  { %v384_v46 = vadd.f32 1.0, %v455_v45 }
 0x2d1   :  { %456 = vrcp.f32 %v384_v46  ;;  %v396_v50 = vand.u32 2147483648, %v384_v46  ;;  %v394_v52 = vand.u32 2147483647, %v384_v46  ;;  %vm390_vm5 = vweird.f32 %v384_v46 }
 0x2d3   :  { %v397_v54 = vor.u32 1.1754944e-38, %v396_v50  ;;  %vm395_vm7 = vcmp.eq.f32.partialorder %v394_v52, 8.507059e+37 }
 0x2d7   :  { %v457_v47 = vpop.eup %456 }
 0x2d8   :  { %v386_v48 = vmul.f32 %v457_v47, %v384_v46  ;;  %vm391_vm4 = vweird.f32 %v457_v47 }
 0x2d9   :  { %vm392_vm6 = vmor %vm390_vm5, %vm391_vm4 }
 0x2da   :  { %v387_v49 = vsub.f32 1.0, %v386_v48 }
 0x2dc   :  { %v388_v51 = vmul.f32 %v457_v47, %v387_v49 }
 0x2de   :  { %v389_v53 = vadd.f32 %v457_v47, %v388_v51 }
 0x2e0   :  { %v393_v55 = vsel %vm392_vm6, %v457_v47, %v389_v53 }
 0x2e1   :  { %v398_v56 = vsel %vm395_vm7, %v397_v54, %v393_v55 }
 0x2e2   :  { %400 = vst [vmem:[#allocation3] sm:$0x1] %v398_v56 }
 0x2e3   :  { %411 = dma.vmem_to_hbm [thread:$0]  %s407_s7, 16, %s409_s28, [#allocation4]  }
 0x2e4   :  { %482 = dma.done.wait [#allocation4], 16  }
 0x2e5   :  { %483 = vsyncadd [#allocation4], 4294967280 }
 0x2e6   :  { %416 = vsyncpa [#allocation4], 1 }

</bundles_post_ra>
